<compile_context>
chip_gen: v6e
topology: v6e:2x2x1
jax: 0.10.0
libtpu: 0.0.40
codegen_flags: <defaults>
</compile_context>

<pallas_src>
import math
import numpy as np
import jax
import jax.numpy as jnp
from jax.experimental import pallas as pl
from jax.experimental.pallas import tpu as pltpu


# ----------------------------------------------------------------------------
# VMEM budget (generation aware): 3/4 of physical VMEM, clamped to [32, 96] MiB.
# v5e/v6e (128 MiB) -> 96 MiB, v7x (64 MiB) -> 48 MiB, unknown -> 48 MiB.
# ----------------------------------------------------------------------------
def _vmem_budget():
    cap = 64 << 20
    try:
        info = pltpu.get_tpu_info()
        cap = int(getattr(info, "vmem_capacity_bytes", cap)) or cap
    except Exception:
        pass
    return max(32 << 20, min((cap * 3) // 4, 96 << 20))


# ----------------------------------------------------------------------------
# Exact (erf) GELU, matching torch.nn.GELU() default, using only exp so it is
# guaranteed to lower on the TPU EUP.  Abramowitz & Stegun 7.1.26, |err|<1.5e-7.
# ----------------------------------------------------------------------------
def _erf_approx(x):
    a1, a2, a3, a4, a5 = 0.254829592, -0.284496736, 1.421413741, -1.453152027, 1.061405429
    p = 0.3275911
    s = jnp.where(x >= 0.0, 1.0, -1.0)
    z = jnp.abs(x)
    t = 1.0 / (1.0 + p * z)
    poly = ((((a5 * t + a4) * t + a3) * t + a2) * t + a1) * t
    return s * (1.0 - poly * jnp.exp(-z * z))


def _gelu_erf(x):
    return 0.5 * x * (1.0 + _erf_approx(x * 0.7071067811865476))


# ----------------------------------------------------------------------------
# Kernel 1: frame-tiled pooling (per-frame slot sums + global-sum accumulator)
# ----------------------------------------------------------------------------
def _build_frame_pool_matrix(ft, resolution, pool_num, dtype):
    """0/1 membership matrix for `ft` frames.
    Row q*pool_num + p sums the tokens of local frame q that belong to spatial
    block p (matching the torch view/permute/mean ordering); the last row sums
    all tokens (global-mean partial).  0/1 entries are exact in any dtype; the
    mean scalings are applied in f32 inside the kernel epilogue."""
    h = int(math.isqrt(resolution))
    g = int(math.isqrt(pool_num))
    assert h * h == resolution, "resolution must be a perfect square"
    assert g * g == pool_num, "pool_num must be a perfect square"
    assert h % g == 0, "sqrt(resolution) must be divisible by sqrt(pool_num)"
    hb = h // g
    m = np.zeros((ft * pool_num + 1, ft * resolution), dtype=np.float32)
    for q in range(ft):
        for gr in range(g):
            for gc in range(g):
                row = q * pool_num + gr * g + gc
                for r in range(hb):
                    for s in range(hb):
                        tok = q * resolution + (gr * hb + r) * h + (gc * hb + s)
                        m[row, tok] = 1.0
    m[-1, :] = 1.0
    return jnp.asarray(m, dtype=dtype)


def _make_pool_kernel(ft, pool_num, slot_scale, global_scale):
    fp = ft * pool_num

    def kernel(pm_ref, x_ref, slot_ref, glob_ref, gacc_ref):
        f = pl.program_id(2)

        @pl.when(f == 0)
        def _():
            gacc_ref[...] = jnp.zeros_like(gacc_ref)

        # (fp+1, ft*res) x (ft*res, ct) -> (fp+1, ct); f32 accumulation on MXU.
        sums = jnp.dot(pm_ref[...], x_ref[0], preferred_element_type=jnp.float32)
        slot_ref[0] = (sums[:fp] * slot_scale).astype(slot_ref.dtype)
        gacc_ref[...] += sums[fp:]

        @pl.when(f == pl.num_programs(2) - 1)
        def _():
            glob_ref[0] = (gacc_ref[...] * global_scale).astype(glob_ref.dtype)

    return kernel


def _pick_frame_tile(frames, resolution, pool_num, ct, itemsize, cap):
    max_ft = max(1, cap // max(1, resolution * ct * itemsize))
    for ft in range(min(frames, max_ft), 0, -1):
        if frames % ft:          # must divide exactly (global-sum correctness)
            continue
        if ft == frames:
            return ft
        if (ft * resolution) % 8 == 0 and (ft * pool_num) % 8 == 0:
            return ft
    return frames                # legal fallback (full-dim blocks)


def _pick_pool_tiles(frames, resolution, pool_num, c, itemsize, budget):
    # per-buffer cap: ~budget/8 (double-buffered), clamped to 16 MiB.
    cap = max(1 << 20, min(budget // 8, 16 << 20))
    if c <= 1536:
        ct = c
    else:
        ct = max(128, min(c, (cap // max(1, resolution * itemsize)) // 128 * 128))
    ft = _pick_frame_tile(frames, resolution, pool_num, ct, itemsize, cap)
    return ft, ct


def pool_tokens(x, resolution, pool_num):
    """Returns (slots (N, F*pool_num, C), global_mean (N, 1, C))."""
    n, k, c = x.shape
    assert k % resolution == 0, "token count must be a multiple of resolution"
    frames = k // resolution
    itemsize = jnp.dtype(x.dtype).itemsize
    budget = _vmem_budget()
    ft, ct = _pick_pool_tiles(frames, resolution, pool_num, c, itemsize, budget)
    f_steps = frames // ft
    fp = ft * pool_num

    pm = _build_frame_pool_matrix(ft, resolution, pool_num, x.dtype)
    slot_scale = 1.0 / float(resolution // pool_num)
    global_scale = 1.0 / float(k)

    grid = (n, pl.cdiv(c, ct), f_steps)
    cost = pl.CostEstimate(
        flops=int(2 * n * k * c * (fp + 1)),
        transcendentals=0,
        bytes_accessed=int((n * k * c + n * frames * pool_num * c + n * c) * itemsize
                           + pm.size * itemsize),
    )
    slots, glob = pl.pallas_call(
        _make_pool_kernel(ft, pool_num, slot_scale, global_scale),
        out_shape=(jax.ShapeDtypeStruct((n, frames * pool_num, c), x.dtype),
                   jax.ShapeDtypeStruct((n, 1, c), x.dtype)),
        grid_spec=pltpu.PrefetchScalarGridSpec(
            num_scalar_prefetch=0,
            grid=grid,
            in_specs=[
                pl.BlockSpec((fp + 1, ft * resolution), lambda b, j, f: (0, 0)),
                pl.BlockSpec((1, ft * resolution, ct), lambda b, j, f: (b, f, j)),
            ],
            out_specs=[
                pl.BlockSpec((1, fp, ct), lambda b, j, f: (b, f, j)),
                pl.BlockSpec((1, 1, ct), lambda b, j, f: (b, 0, j)),
            ],
            scratch_shapes=[pltpu.VMEM((1, ct), jnp.float32)],
        ),
        compiler_params=pltpu.CompilerParams(
            dimension_semantics=("parallel", "parallel", "arbitrary"),
            vmem_limit_bytes=int(budget),
        ),
        cost_estimate=cost,
    )(pm, x)
    return slots, glob


# ----------------------------------------------------------------------------
# Kernel 2: fused two-layer MLP (Linear -> GELU -> Linear) in one pallas_call.
# Grid = (row tiles, hidden tiles); the GELU'd (tm, th) hidden tile is consumed
# by the layer-2 contraction in the same step; f32 (tm, Dout) accumulator.
# ----------------------------------------------------------------------------
def _make_fused_mlp_kernel(single_h):
    if single_h:
        def kernel(x_ref, w1_ref, b1_ref, w2_ref, b2_ref, o_ref):
            hid = jnp.dot(x_ref[...], w1_ref[...], preferred_element_type=jnp.float32)
            hid = _gelu_erf(hid + b1_ref[...].astype(jnp.float32))
            y = jnp.dot(hid.astype(w2_ref.dtype), w2_ref[...],
                        preferred_element_type=jnp.float32)
            o_ref[...] = (y + b2_ref[...].astype(jnp.float32)).astype(o_ref.dtype)
        return kernel

    def kernel(x_ref, w1_ref, b1_ref, w2_ref, b2_ref, o_ref, acc_ref):
        h = pl.program_id(1)

        @pl.when(h == 0)
        def _():
            acc_ref[...] = jnp.zeros_like(acc_ref)

        hid = jnp.dot(x_ref[...], w1_ref[...], preferred_element_type=jnp.float32)
        hid = _gelu_erf(hid + b1_ref[...].astype(jnp.float32))
        acc_ref[...] += jnp.dot(hid.astype(w2_ref.dtype), w2_ref[...],
                                preferred_element_type=jnp.float32)

        @pl.when(h == pl.num_programs(1) - 1)
        def _():
            o_ref[...] = (acc_ref[...] + b2_ref[...].astype(jnp.float32)).astype(o_ref.dtype)

    return kernel


def _reduction_tile(k, target, align=128):
    # exact divisor of k (multiple of `align`) or the full dim.
    if k <= target:
        return k
    t = max(align, (target // align) * align)
    while t >= align:
        if k % t == 0:
            return t
        t -= align
    return k


def _pick_mlp_tiles(r, c, dh, dout, itemsize, budget):
    tm = r if r <= 512 else 512
    th = _reduction_tile(dh, 1024)

    def footprint(tm_, th_):
        return ((2 * tm_ * c + 2 * c * th_ + 2 * th_ * dout +
                 2 * tm_ * dout + 2 * (th_ + dout)) * itemsize
                + tm_ * dout * 4)          # f32 accumulator

    while footprint(tm, th) > budget and th > 128:
        nt = _reduction_tile(dh, max(128, th // 2))
        if nt >= th:
            break
        th = nt
    while footprint(tm, th) > budget and tm > 128:
        tm = max(128, ((tm // 2) + 7) // 8 * 8)
    return tm, th


def fused_mlp(x2d, w1, b1, w2, b2):
    r, c = x2d.shape
    c2, dh = w1.shape
    dh2, dout = w2.shape
    assert c == c2 and dh == dh2
    itemsize = jnp.dtype(x2d.dtype).itemsize
    budget = _vmem_budget()
    tm, th = _pick_mlp_tiles(r, c, dh, dout, itemsize, budget)
    h_steps = dh // th
    single_h = (h_steps == 1)
    grid = (pl.cdiv(r, tm), h_steps)

    cost = pl.CostEstimate(
        flops=int(2 * r * c * dh + 2 * r * dh * dout),
        transcendentals=int(r * dh),
        bytes_accessed=int((r * c + c * dh + dh + dh * dout + dout + r * dout) * itemsize),
    )
    scratch = [] if single_h else [pltpu.VMEM((tm, dout), jnp.float32)]
    return pl.pallas_call(
        _make_fused_mlp_kernel(single_h),
        out_shape=jax.ShapeDtypeStruct((r, dout), x2d.dtype),
        grid_spec=pltpu.PrefetchScalarGridSpec(
            num_scalar_prefetch=0,
            grid=grid,
            in_specs=[
                pl.BlockSpec((tm, c), lambda i, h: (i, 0)),     # rows (resident across h)
                pl.BlockSpec((c, th), lambda i, h: (0, h)),     # W1 column tile
                pl.BlockSpec((1, th), lambda i, h: (0, h)),     # b1 tile
                pl.BlockSpec((th, dout), lambda i, h: (h, 0)),  # W2 row tile
                pl.BlockSpec((1, dout), lambda i, h: (0, 0)),   # b2
            ],
            out_specs=pl.BlockSpec((tm, dout), lambda i, h: (i, 0)),  # lane-dense output
            scratch_shapes=scratch,
        ),
        compiler_params=pltpu.CompilerParams(
            dimension_semantics=("parallel", "arbitrary"),
            vmem_limit_bytes=int(budget),
        ),
        cost_estimate=cost,
    )(x2d, w1, b1.reshape(1, dh), w2, b2.reshape(1, dout))


# ----------------------------------------------------------------------------
# PoolProjector.forward
# ----------------------------------------------------------------------------
def pool_projector_forward(inputs, mlp_params, resolution, pool_num):
    w1, b1, w2, b2 = mlp_params
    dout = w2.shape[1]

    def extend(t):  # (N, K, C) -> (N, K + F*pool_num + 1, C), torch cat order
        slots, glob = pool_tokens(t, resolution, pool_num)
        return jnp.concatenate([t, slots, glob], axis=1)

    if isinstance(inputs, (list, tuple)):
        images, features = inputs
        assert images.shape[1] == resolution
        img_ext = extend(images)
        ft_ext = extend(features)
        c = images.shape[-1]
        # single MLP call over ALL rows (one streaming pass over W1/W2)
        combine = jnp.concatenate(
            [img_ext.reshape(-1, c), ft_ext.reshape(-1, c)], axis=0)
        out = fused_mlp(combine, w1, b1, w2, b2)
        n_img = img_ext.shape[0] * img_ext.shape[1]
        out_images = out[:n_img].reshape(img_ext.shape[0], img_ext.shape[1], dout)
        out_features = out[n_img:].reshape(ft_ext.shape[0], ft_ext.shape[1], dout)
        return out_images, out_features

    n, k, c = inputs.shape
    ext = extend(inputs)
    out = fused_mlp(ext.reshape(-1, c), w1, b1, w2, b2)
    return out.reshape(n, ext.shape[1], dout)


# ----------------------------------------------------------------------------
# Pure-JAX reference mirroring the torch ops (exact-erf GELU)
# ----------------------------------------------------------------------------
def _ref_mlp(x, w1, b1, w2, b2):
    h = jax.nn.gelu(x @ w1 + b1, approximate=False)
    return h @ w2 + b2


def _ref_slot_global(x, resolution, pool_num):
    n, k, c = x.shape
    h = int(math.isqrt(resolution))
    g = int(math.isqrt(pool_num))
    hb = h // g
    f = k // resolution
    maps = x.reshape(n, f, g, hb, g, hb, c).transpose(0, 1, 2, 4, 3, 5, 6)
    maps = maps.reshape(n, f, pool_num, resolution // pool_num, c)
    slot = maps.mean(axis=-2).reshape(n, f * pool_num, c)
    glob = x.mean(axis=1, keepdims=True)
    return jnp.concatenate([x, slot, glob], axis=1)


def ref_forward(inputs, params, resolution, pool_num):
    w1, b1, w2, b2 = params
    if isinstance(inputs, (list, tuple)):
        images, features = inputs
        c = images.shape[-1]
        images_ext = _ref_slot_global(images, resolution, pool_num)
        features_ext = _ref_slot_global(features, resolution, pool_num)
        combine = jnp.concatenate(
            [images_ext.reshape(-1, c), features_ext.reshape(-1, c)], axis=0)
        out = _ref_mlp(combine, w1, b1, w2, b2)
        n_img = images_ext.shape[0] * images_ext.shape[1]
        d = out.shape[-1]
        return (out[:n_img].reshape(*images_ext.shape[:2], d),
                out[n_img:].reshape(*features_ext.shape[:2], d))
    n, k, c = inputs.shape
    ext = _ref_slot_global(inputs, resolution, pool_num)
    return _ref_mlp(ext.reshape(-1, c), w1, b1, w2, b2).reshape(n, ext.shape[1], -1)


# ----------------------------------------------------------------------------
if __name__ == "__main__":
    key = jax.random.PRNGKey(0)
    resolution = 16      # h = 4
    pool_num = 4         # grid = 2
    n, frames, c, dh, dout = 2, 2, 32, 64, 64
    k = frames * resolution

    k_x, k_im, k_ft, k_w1, k_b1, k_w2, k_b2 = jax.random.split(key, 7)
    x = jax.random.normal(k_x, (n, k, c), dtype=jnp.float32)
    images = jax.random.normal(k_im, (n, resolution, c), dtype=jnp.float32)
    features = jax.random.normal(k_ft, (n, k, c), dtype=jnp.float32)

    # deterministic synthetic MLP params (trunc_normal-style scale)
    w1 = 0.02 * jax.random.normal(k_w1, (c, dh), dtype=jnp.float32)
    b1 = 0.02 * jax.random.normal(k_b1, (dh,), dtype=jnp.float32)
    w2 = 0.02 * jax.random.normal(k_w2, (dh, dout), dtype=jnp.float32)
    b2 = 0.02 * jax.random.normal(k_b2, (dout,), dtype=jnp.float32)
    params = (w1, b1, w2, b2)

    # --- single-tensor path ---
    out = pool_projector_forward(x, params, resolution, pool_num)
    out = jax.block_until_ready(out)
    ref = ref_forward(x, params, resolution, pool_num)
    assert out.shape == (n, k + frames * pool_num + 1, dout), out.shape
    np.testing.assert_allclose(np.asarray(out), np.asarray(ref), rtol=2e-4, atol=2e-5)

    # --- list (images, features) path ---
    out_img, out_ft = pool_projector_forward((images, features), params, resolution, pool_num)
    out_img = jax.block_until_ready(out_img)
    out_ft = jax.block_until_ready(out_ft)
    ref_img, ref_ft = ref_forward((images, features), params, resolution, pool_num)
    np.testing.assert_allclose(np.asarray(out_img), np.asarray(ref_img), rtol=2e-4, atol=2e-5)
    np.testing.assert_allclose(np.asarray(out_ft), np.asarray(ref_ft), rtol=2e-4, atol=2e-5)

    print("KERNEL_OK")
</pallas_src>

<mosaic_0001>
module attributes {stable_mosaic.version = 11 : i64} {
  func.func @kernel(%arg0: i32, %arg1: i32, %arg2: i32, %arg3: memref<9x32xf32, #tpu.memory_space<vmem>>, %arg4: memref<1x32x32xf32, #tpu.memory_space<vmem>>, %arg5: memref<1x8x32xf32, #tpu.memory_space<vmem>>, %arg6: memref<1x1x32xf32, #tpu.memory_space<vmem>>, %arg7: memref<1x32xf32, #tpu.memory_space<vmem>>) attributes {dimension_semantics = [#tpu.dimension_semantics<parallel>, #tpu.dimension_semantics<parallel>, #tpu.dimension_semantics<arbitrary>], iteration_bounds = array<i64: 2, 1, 1>, scalar_prefetch = 0 : i64, scratch_operands = 1 : i64, tpu.core_type = #tpu.core_type<tc>, window_params = [{pipeline_mode = #tpu.pipeline_mode<synchronous>, transform_indices = @transform_0, window_bounds = array<i64: 9, 32>}, {transform_indices = @transform_1, window_bounds = array<i64: 1, 32, 32>}, {transform_indices = @transform_2, window_bounds = array<i64: 1, 8, 32>}, {transform_indices = @transform_3, window_bounds = array<i64: 1, 1, 32>}]} {
    %c0_i32 = arith.constant 0 : i32
    %0 = arith.cmpi eq, %arg2, %c0_i32 : i32
    %1 = arith.extui %0 : i1 to i32
    %c0_i32_0 = arith.constant 0 : i32
    %2 = arith.cmpi ne, %1, %c0_i32_0 : i32
    scf.if %2 {
      %cst_15 = arith.constant 0.000000e+00 : f32
      %20 = vector.broadcast %cst_15 : f32 to vector<1x32xf32>
      %c0_16 = arith.constant 0 : index
      %c0_17 = arith.constant 0 : index
      %21 = vector.load %arg7[%c0_16, %c0_17] : memref<1x32xf32, #tpu.memory_space<vmem>>, vector<1x32xf32>
      tpu.vector_store %arg7[%c0_16, %c0_17], %20 {strides = array<i32>} : memref<1x32xf32, #tpu.memory_space<vmem>>, vector<1x32xf32>,
    } else {
    }
    %c0 = arith.constant 0 : index
    %c0_1 = arith.constant 0 : index
    %3 = vector.load %arg3[%c0, %c0_1] : memref<9x32xf32, #tpu.memory_space<vmem>>, vector<9x32xf32>
    %c0_2 = arith.constant 0 : index
    %c0_3 = arith.constant 0 : index
    %c0_4 = arith.constant 0 : index
    %4 = vector.load %arg4[%c0_2, %c0_3, %c0_4] : memref<1x32x32xf32, #tpu.memory_space<vmem>>, vector<1x32x32xf32>
    %5 = vector.shape_cast %4 : vector<1x32x32xf32> to vector<32x32xf32>
    %cst = arith.constant dense<0.000000e+00> : vector<9x32xf32>
    %6 = tpu.matmul %3, %5, %cst {dimension_numbers = #tpu.dot_dimension_numbers<[1], [0], [0], [1], [0, 0, 1, 1], [], []>} : vector<9x32xf32>, vector<32x32xf32>, vector<9x32xf32> -> vector<9x32xf32>
    %7 = vector.extract_strided_slice %6 {offsets = [0, 0], sizes = [8, 32], strides = [1, 1]} : vector<9x32xf32> to vector<8x32xf32>
    %cst_5 = arith.constant 2.500000e-01 : f32
    %8 = vector.broadcast %cst_5 : f32 to vector<8x32xf32>
    %9 = arith.mulf %7, %8 : vector<8x32xf32>
    %c0_6 = arith.constant 0 : index
    %c0_7 = arith.constant 0 : index
    %c0_8 = arith.constant 0 : index
    %10 = vector.load %arg5[%c0_6, %c0_7, %c0_8] : memref<1x8x32xf32, #tpu.memory_space<vmem>>, vector<1x8x32xf32>
    %11 = vector.shape_cast %10 : vector<1x8x32xf32> to vector<8x32xf32>
    %12 = vector.shape_cast %9 : vector<8x32xf32> to vector<1x8x32xf32>
    tpu.vector_store %arg5[%c0_6, %c0_7, %c0_8], %12 {strides = array<i32>} : memref<1x8x32xf32, #tpu.memory_space<vmem>>, vector<1x8x32xf32>,
    %c0_9 = arith.constant 0 : index
    %c0_10 = arith.constant 0 : index
    %13 = vector.load %arg7[%c0_9, %c0_10] : memref<1x32xf32, #tpu.memory_space<vmem>>, vector<1x32xf32>
    %14 = vector.extract_strided_slice %6 {offsets = [8, 0], sizes = [1, 32], strides = [1, 1]} : vector<9x32xf32> to vector<1x32xf32>
    %15 = arith.addf %13, %14 : vector<1x32xf32>
    %c0_11 = arith.constant 0 : index
    %c0_12 = arith.constant 0 : index
    %16 = vector.load %arg7[%c0_11, %c0_12] : memref<1x32xf32, #tpu.memory_space<vmem>>, vector<1x32xf32>
    tpu.vector_store %arg7[%c0_11, %c0_12], %15 {strides = array<i32>} : memref<1x32xf32, #tpu.memory_space<vmem>>, vector<1x32xf32>,
    %c0_i32_13 = arith.constant 0 : i32
    %17 = arith.cmpi eq, %arg2, %c0_i32_13 : i32
    %18 = arith.extui %17 : i1 to i32
    %c0_i32_14 = arith.constant 0 : i32
    %19 = arith.cmpi ne, %18, %c0_i32_14 : i32
    scf.if %19 {
      %c0_15 = arith.constant 0 : index
      %c0_16 = arith.constant 0 : index
      %20 = vector.load %arg7[%c0_15, %c0_16] : memref<1x32xf32, #tpu.memory_space<vmem>>, vector<1x32xf32>
      %cst_17 = arith.constant 3.125000e-02 : f32
      %21 = vector.broadcast %cst_17 : f32 to vector<1x32xf32>
      %22 = arith.mulf %20, %21 : vector<1x32xf32>
      %c0_18 = arith.constant 0 : index
      %c0_19 = arith.constant 0 : index
      %c0_20 = arith.constant 0 : index
      %23 = vector.load %arg6[%c0_18, %c0_19, %c0_20] : memref<1x1x32xf32, #tpu.memory_space<vmem>>, vector<1x1x32xf32>
      %24 = vector.shape_cast %23 : vector<1x1x32xf32> to vector<1x32xf32>
      %25 = vector.shape_cast %22 : vector<1x32xf32> to vector<1x1x32xf32>
      tpu.vector_store %arg6[%c0_18, %c0_19, %c0_20], %25 {strides = array<i32>} : memref<1x1x32xf32, #tpu.memory_space<vmem>>, vector<1x1x32xf32>,
    } else {
    }
    return
  }
  func.func @transform_0(%arg0: i32, %arg1: i32, %arg2: i32) -> (i32, i32) {
    %c0_i32 = arith.constant 0 : i32
    %c0_i32_0 = arith.constant 0 : i32
    %c0_i32_1 = arith.constant 0 : i32
    return %c0_i32, %c0_i32_0 : i32, i32
  }
  func.func @transform_1(%arg0: i32, %arg1: i32, %arg2: i32) -> (i32, i32, i32) {
    %c0_i32 = arith.constant 0 : i32
    return %arg0, %arg2, %arg1 : i32, i32, i32
  }
  func.func @transform_2(%arg0: i32, %arg1: i32, %arg2: i32) -> (i32, i32, i32) {
    %c0_i32 = arith.constant 0 : i32
    return %arg0, %arg2, %arg1 : i32, i32, i32
  }
  func.func @transform_3(%arg0: i32, %arg1: i32, %arg2: i32) -> (i32, i32, i32) {
    %c0_i32 = arith.constant 0 : i32
    %c0_i32_0 = arith.constant 0 : i32
    return %arg0, %c0_i32, %arg1 : i32, i32, i32
  }
}

</mosaic_0001>

<bundles_post_ra>
// kernel: tpu_custom_call.1
= control target key start
LH: loop header
LB: loop body
LE: loop exit
PB: predicated region body
PF: predicated region fallthrough
CT: control target
= control target key end

     0   :  { %9 = vsyncpa [#allocation4], 0  ;;  %s1028_s0 = inlined_call_operand.hbm [shape: f32[9,32], index: 0, kind: input, shape index: {}]   ;;  %s1029_s1 = inlined_call_operand.hbm [shape: f32[2,32,32], index: 1, kind: input, shape index: {}]   ;;  %s1030_s2 = inlined_call_operand.hbm [shape: f32[2,8,32], index: 2, kind: output, shape index: {0}]   ;;  %s1031_s3 = inlined_call_operand.hbm [shape: f32[2,1,32], index: 3, kind: output, shape index: {1}]  }
   0x1   :  { %10 = vsyncpa [#allocation7], 0 }
   0x2   :  { %12 = vsyncpa [#allocation7 + $0x1], 0 }
   0x3   :  { %13 = vsyncpa [#allocation5], 0 }
   0x4   :  { %15 = vsyncpa [#allocation5 + $0x1], 0 }
   0x5   :  { %16 = vsyncpa [#allocation10], 0 }
   0x6   :  { %18 = vsyncpa [#allocation10 + $0x1], 0  ;;  %s830_s12 = smov 0   ;;  %s832_s13 = smov 0  }
   0x7   :  { %s834_s14 = smov 0   ;;  %s836_s15 = smov 0  }
   0x8   :  { %s838_s16 = smov 0   ;;  %s840_s17 = smov 0  }
   0x9 LB: > { %s515_s18 = sadd.s32 4294967295, %s801_s17   ;;  %s516_s19 = sadd.s32 4294967294, %s801_s17   ;;  %s801_s17 = sphi %s840_s17, %s24_s17   ;;  %s797_s16 = sphi %s838_s16, %s1053_s16   ;;  %s793_s15 = sphi %s836_s15, %s1052_s15   ;;  %s789_s14 = sphi %s834_s14, %s1051_s14   ;;  %s785_s13 = sphi %s832_s13, %s1050_s13   ;;  %s781_s12 = sphi %s830_s12, %s1049_s12  }
   0xa   : > { %p88_p0 = scmp.ne.s32.totalorder %s785_s13, %s781_s12  ;;  %p864_p1 = scmp.eq.s32.totalorder %s515_s18, 0 }
   0xb   : > { %p868_p2 = scmp.eq.s32.totalorder %s515_s18, 1  ;;  %p122_p3 = scmp.eq.s32.totalorder %s516_s19, 1 }
   0xc   : > { %p874_p4 = por %p864_p1, %p88_p0  ;;  %p517_p5 = scmp.ge.s32.totalorder %s801_s17, 1 }
   0xd   : > { %p879_p6 = por %p122_p3, %p88_p0  ;;  %p157_p7 = scmp.lt.s32.totalorder %s801_s17, 3 }
   0xe   : > { %s1037_s22 = scalar_select %p874_p4, 1, 0 }
   0xf   : > { %s1038_s23 = scalar_select %p879_p6, 1, 0 }
  0x10   : > { %p884_p8 = pnand %p517_p5, %p157_p7  ;;  %s803_s25 = smov [#allocation3]  }
  0x11   : > { %s169_s26 = sshll.u32 %s803_s25, 4  ;;  %s43_s28 = sadd.s32 1, %s797_s16  ;;  %s170_s26 = int_to_ptr.vmem [resolvable:$true] %s169_s26 }
  0x12   : > { %p562_p9 = pneg %p884_p8  ;;  %s644_s29 = scalar_lea.vmem %s170_s26, 256 }
  0x13   : > { %p645_p13 = scmp.ne.s32.totalorder %s170_s26, %s644_s29  ;;  %p652_p5 = scmp.lt.s32.totalorder %s170_s26, %s170_s26 }
  0x14   : > { %p893_p11 = pnand %p562_p9, %p864_p1  ;;  %p653_p7 = scmp.lt.s32.totalorder %s644_s29, %s644_s29 }
  0x16   : > { %p635_p12 = pneg %p893_p11  ;;  %p654_p6 = por %p653_p7, %p652_p5 }
  0x18   : > { %p647_p0 = pnand %p645_p13, %p635_p12 }
  0x1a   : > { %p648_p3 = pneg %p647_p0 }
  0x1c   : > { %p655_p4 = pnand %p654_p6, %p648_p3 }
  0x1e   : > { %658 = shalt.err (!%p655_p4)
}
  0x1f   : > { %s1033_s30 = smov 128   ;;  %s1034_s4 = smov 8  }
  0x20   : > { %565 = dma.hbm_to_vmem [thread:$0]  (!%p893_p11), %s1028_s0, 256, %s170_s26, [#allocation4], %s1033_s30, %s1033_s30, %s1034_s4  }
  0x21   : > { %p45_p4 = scmp.ge.s32.totalorder %s43_s28, 2  ;;  %s75_s7 = sadd.s32 1, %s789_s14 }
  0x22   : > { %p82_p6 = scmp.ne.s32.totalorder %s789_s14, %s785_s13  ;;  %p83_p9 = scmp.eq.s32.totalorder %s801_s17, 0 }
  0x23   : > { %s1055_s28 = smov (%p45_p4, %s43_s28), 0  ;;  %p578_p0 = scmp.lt.s32.totalorder %s801_s17, 2 }
  0x24   : > { %p914_p12 = por %p83_p9, %p82_p6  ;;  %p920_p13 = por %p868_p2, %p82_p6 }
  0x25   : > { %s68_s10 = ssub.s32 %s797_s16, %s1055_s28  ;;  %s183_s11 = sand.u32 1, %s789_s14  }
  0x26   : > { %p73_p11 = scmp.eq.s32.totalorder %s68_s10, 0  ;;  %s520_s18 = sshll.u32 %s183_s11, 5 }
  0x27   : > { %s534_s25 = sshll.u32 %s797_s16, 9  ;;  %s187_s5 = scalar_lea.vmem [#allocation6], %s520_s18 }
  0x28   : > { %s929_s19 = scalar_select %p73_p11, %s789_s14, %s75_s7  }
  0x29   : > { %s196_s29 = scalar_lea.hbm %s1029_s1, %s534_s25  ;;  %s197_s6 = sshll.u32 %s187_s5, 4  ;;  %s198_s6 = int_to_ptr.vmem [resolvable:$true] %s197_s6 }
  0x2a   : > { %p937_p2 = pnand %p578_p0, %p914_p12  ;;  %s184_s30 = scalar_lea.sflag [#allocation7], %s183_s11 }
  0x2b   : > { %s672_s10 = scalar_lea.vmem %s198_s6, 512  ;;  %s806_s7 = smov [#allocation6]  }
  0x2c   : > { %p661_p3 = pneg %p937_p2  ;;  %p673_p5 = scmp.ne.s32.totalorder %s198_s6, %s672_s10 }
  0x2d   : > { %s677_s4 = sshll.u32 %s806_s7, 4  ;;  %s678_s4 = int_to_ptr.vmem [resolvable:$false] %s677_s4 }
  0x2e   : > { %p675_p7 = pnand %p673_p5, %p661_p3  ;;  %s679_s25 = scalar_lea.vmem %s678_s4, 1024 }
  0x2f   : > { %p680_p6 = scmp.lt.s32.totalorder %s198_s6, %s678_s4  ;;  %p681_p9 = scmp.lt.s32.totalorder %s679_s25, %s672_s10 }
  0x30   : > { %p676_p4 = pneg %p675_p7 }
  0x31   : > { %p682_p11 = por %p681_p9, %p680_p6 }
  0x33   : > { %p683_p10 = pnand %p682_p11, %p676_p4 }
  0x35   : > { %686 = shalt.err (!%p683_p10)
}
  0x36   : > { %s1044_s8 = smov 8   ;;  %s1045_s18 = smov 128  }
  0x37   : > { %569 = dma.hbm_to_vmem [thread:$0]  (!%p937_p2), %s196_s29, 512, %s198_s6, %s184_s30, %s1045_s18, %s1045_s18, %s1044_s8  }
  0x38   : > { %209 = sbr.rel (%p884_p8) target bundleno = 309 (0x135), region = 28 }
  0x3d   : > { %764 = dma.done.wait (%p864_p1), [#allocation4], 256  }
  0x3e   : > { %766 = vsyncadd (%p864_p1), [#allocation4], 4294967040  ;;  %s955_s4 = sand.u32 1, %s785_s13   ;;  %p1046_p10 = scmp.ne.s32.totalorder %s1037_s22, 0 }
  0x3f   : > { %s525_s11 = sshll.u32 %s955_s4, 5  ;;  %s216_s26 = scalar_lea.sflag [#allocation7], %s955_s4 }
  0x40   : > { %s219_s27 = scalar_lea.vmem [#allocation6], %s525_s11 }
  0x41   : > { %768 = dma.done.wait (%p1046_p10), %s216_s26, 512  }
  0x42   : > { %770 = vsyncadd (%p1046_p10), %s216_s26, 4294966784  ;;  %vm251_vm0 = vcmask 253952   ;;  %v807_v0 = vmov 0.0   ;;  %vm259_vm1 = vcmask 261120   ;;  %v258_v1 = vld [vmem:[%s219_s27 + $0x18] sm:$0xff]  ;;  %v257_v2 = vld [vmem:[%s219_s27 + $0x10] sm:$0xff] }
  0x43   : > { %252 = vst.msk [vmem:[#allocation2] sm:$0x1] %vm251_vm0, %v807_v0  ;;  %541 = vmatprep.subr.mxu0 %v258_v1  ;;  %v253_v3 = vld [vmem:[#allocation3] sm:$0xff]  ;;  %v256_v4 = vld [vmem:[%s219_s27 + $0x8] sm:$0xff]  ;;  %v255_v5 = vld [vmem:[%s219_s27] sm:$0xff]  ;;  %s526_s20 = sshll.u32 %s955_s4, 3 }
  0x44   : > { %542 = vmatpush3.msra.mxu0 %v258_v1  ;;  %549 = vmatprep.mubr.msk.f32.mxu0 %vm259_vm1, %v253_v3  ;;  %v254_v6 = vld [vmem:[#allocation3 + $0x8] sm:$0x1]  ;;  %s530_s22 = sshll.u32 %s793_s15, 7  ;;  %s239_s24 = scalar_lea.vmem [#allocation8], %s526_s20 }
  0x45   : > { %543 = vmatprep.subr.mxu0 %v257_v2  ;;  %s373_s30 = sshll.u32 %s239_s24, 4  ;;  %s371_s6 = scalar_lea.hbm %s1030_s2, %s530_s22  ;;  %s374_s30 = int_to_ptr.vmem [resolvable:$true] %s373_s30 }
  0x46   : > { %544 = vmatpush3.msra.mxu0 %v257_v2  ;;  %s354_s21 = scalar_lea.sflag [#allocation5], %s955_s4  ;;  %s687_s10 = scalar_lea.vmem %s374_s30, 128 }
  0x47   : > { %545 = vmatprep.subr.mxu0 %v256_v4  ;;  %p688_p1 = scmp.ne.s32.totalorder %s374_s30, %s687_s10  ;;  %s808_s7 = smov [#allocation8]  }
  0x48   : > { %546 = vmatpush3.msra.mxu0 %v256_v4  ;;  %s691_s25 = sshll.u32 %s808_s7, 4  ;;  %s692_s25 = int_to_ptr.vmem [resolvable:$false] %s691_s25 }
  0x49   : > { %547 = vmatprep.subr.mxu0 %v255_v5  ;;  %p689_p8 = pnand %p688_p1, %p920_p13  ;;  %s693_s8 = scalar_lea.vmem %s692_s25, 256 }
  0x4a   : > { %548 = vmatpush3.msra.mxu0 %v255_v5  ;;  %v343_v7 = vld [vmem:[#allocation2] sm:$0x1]  ;;  %p694_p0 = scmp.lt.s32.totalorder %s374_s30, %s692_s25  ;;  %p695_p2 = scmp.lt.s32.totalorder %s693_s8, %s687_s10 }
  0x4b   : > { %550 = vmatmul.mubr.msk.f32.vlgmr.msra.gmra.mxu0 %vm259_vm1, %v254_v6  ;;  %p690_p12 = pneg %p689_p8 }
  0x4c   : > { %p696_p3 = por %p695_p2, %p694_p0 }
  0x4e   : > { %p697_p5 = pnand %p696_p3, %p690_p12 }
 0x10b   : > { %v551_v8 = vpop.f32.mrf.mxu0 }
 0x10c   : > { %v344_v9 = vadd.f32 %v551_v8, %v343_v7 }
 0x10d   : > { %v332_v10 = vpop.f32.mrf.mxu0 }
 0x10e   : > { %346 = vst.msk [vmem:[#allocation2] sm:$0x1] %vm251_vm0, %v344_v9  ;;  %v341_v11 = vmul.f32 0.25, %v332_v10 }
 0x110   : > { %342 = vst.msk [vmem:[%s239_s24] sm:$0xff] %vm259_vm1, %v341_v11 }
 0x111   : > { %700 = shalt.err (!%p697_p5)
}
 0x112   : > { %s701_s18 = scalar_lea.hbm %s371_s6, 128  ;;  %s705_s27 = scalar_lea.hbm %s1030_s2, 256 }
 0x113   : > { %p702_p7 = scmp.ne.s32.totalorder %s371_s6, %s701_s18  ;;  %p706_p9 = scmp.lt.s32.totalorder %s371_s6, %s1030_s2 }
 0x114   : > { %p707_p11 = scmp.lt.s32.totalorder %s705_s27, %s701_s18 }
 0x115   : > { %p703_p4 = pnand %p702_p7, %p920_p13 }
 0x116   : > { %p708_p10 = por %p707_p11, %p706_p9 }
 0x117   : > { %p704_p6 = pneg %p703_p4 }
 0x119   : > { %p709_p1 = pnand %p708_p10, %p704_p6 }
 0x11b   : > { %712 = shalt.err (!%p709_p1)
}
 0x11c   : > { %558 = dma.vmem_to_hbm [thread:$0]  (%p920_p13), %s374_s30, 128, %s371_s6, %s354_s21   ;;  %v350_v12 = vld [vmem:[#allocation2] sm:$0x1] }
 0x11d   : > { %s531_s24 = sshll.u32 %s793_s15, 4  ;;  %s245_s29 = scalar_lea.vmem [#allocation9], %s955_s4  ;;  %v351_v13 = vmul.f32 0.03125, %v350_v12 }
 0x11e   : > { %s387_s5 = sshll.u32 %s245_s29, 4  ;;  %s385_s25 = scalar_lea.hbm %s1031_s3, %s531_s24  ;;  %s388_s5 = int_to_ptr.vmem [resolvable:$true] %s387_s5 }
 0x11f   : > { %352 = vst.msk [vmem:[%s245_s29] sm:$0x1] %vm251_vm0, %v351_v13  ;;  %s359_s8 = scalar_lea.sflag [#allocation10], %s955_s4  ;;  %s713_s18 = scalar_lea.vmem %s388_s5, 16 }
 0x120   : > { %p714_p8 = scmp.ne.s32.totalorder %s388_s5, %s713_s18  ;;  %s809_s11 = smov [#allocation9]  }
 0x121   : > { %s717_s30 = sshll.u32 %s809_s11, 4  ;;  %s718_s30 = int_to_ptr.vmem [resolvable:$false] %s717_s30 }
 0x122   : > { %p715_p12 = pnand %p714_p8, %p920_p13  ;;  %s719_s15 = scalar_lea.vmem %s718_s30, 32 }
 0x123   : > { %p720_p2 = scmp.lt.s32.totalorder %s388_s5, %s718_s30  ;;  %p721_p3 = scmp.lt.s32.totalorder %s719_s15, %s713_s18 }
 0x124   : > { %p716_p0 = pneg %p715_p12 }
 0x125   : > { %p722_p5 = por %p721_p3, %p720_p2 }
 0x127   : > { %p723_p7 = pnand %p722_p5, %p716_p0 }
 0x129   : > { %726 = shalt.err (!%p723_p7)
}
 0x12a   : > { %s727_s6 = scalar_lea.hbm %s385_s25, 16  ;;  %s731_s26 = scalar_lea.hbm %s1031_s3, 32 }
 0x12b   : > { %p728_p4 = scmp.ne.s32.totalorder %s385_s25, %s727_s6  ;;  %p732_p11 = scmp.lt.s32.totalorder %s385_s25, %s1031_s3 }
 0x12c   : > { %p733_p10 = scmp.lt.s32.totalorder %s731_s26, %s727_s6 }
 0x12d   : > { %p729_p6 = pnand %p728_p4, %p920_p13 }
 0x12e   : > { %p734_p1 = por %p733_p10, %p732_p11 }
 0x12f   : > { %p730_p9 = pneg %p729_p6 }
 0x131   : > { %p735_p8 = pnand %p734_p1, %p730_p9 }
 0x133   : > { %738 = shalt.err (!%p735_p8)
}
 0x134   : > { %559 = dma.vmem_to_hbm [thread:$0]  (%p920_p13), %s388_s5, 16, %s385_s25, %s359_s8  }
 0x135 PF: > { %s399_s22 = sand.u32 1, %s781_s12   ;;  %p1047_p12 = scmp.ne.s32.totalorder %s1038_s23, 0 }
 0x136   : > { %p1048_p0 = scmp.ge.s32.totalorder %s801_s17, 2  ;;  %s400_s24 = scalar_lea.sflag [#allocation5], %s399_s22 }
 0x138   : > { %p571_p2 = pnand %p1048_p0, %p1047_p12 }
 0x13a   : > { %p572_p3 = pneg %p571_p2 }
 0x13c   : > { %772 = dma.done.wait (%p572_p3), %s400_s24, 128  }
 0x13d   : > { %774 = vsyncadd (%p572_p3), %s400_s24, 4294967168  ;;  %s409_s29 = scalar_lea.sflag [#allocation10], %s399_s22 }
 0x13e   : > { %776 = dma.done.wait (%p572_p3), %s409_s29, 16  }
 0x13f   : > { %778 = vsyncadd (%p572_p3), %s409_s29, 4294967280  ;;  %s24_s17 = sadd.s32 1, %s801_s17   ;;  %s1049_s12 = smov %s785_s13 }
 0x140   : > { %p21_p5 = scmp.ge.s32.totalorder %s24_s17, 4   ;;  %s1050_s13 = smov %s789_s14 }
 0x141   : > { %s1051_s14 = smov %s929_s19  ;;  %s1052_s15 = smov %s797_s16 }
 0x142   : > { %s1053_s16 = smov %s1055_s28  ;;  %23 = sbr.rel (!%p21_p5) target bundleno = 9 (0x9), region = 103 }
 0x147   :  { %413 = vsyncpa [#allocation4], 1 }
 0x148   :  { %415 = vsyncpa [#allocation4 + $0x1], 1 }
 0x149   :  { %416 = vsyncpa [#allocation7], 1 }
 0x14a   :  { %418 = vsyncpa [#allocation7 + $0x1], 1 }
 0x14b   :  { %419 = vsyncpa [#allocation5], 1 }
 0x14c   :  { %421 = vsyncpa [#allocation5 + $0x1], 1 }
 0x14d   :  { %422 = vsyncpa [#allocation10], 1 }
 0x14e   :  { %424 = vsyncpa [#allocation10 + $0x1], 1 }

</bundles_post_ra>
